<compile_context>
chip_gen: v5e
topology: v5e:2x2
jax: 0.10.0
libtpu: 0.0.40
codegen_flags: <defaults>
</compile_context>

<pallas_src>
import math
import functools

import jax
import jax.numpy as jnp
import numpy as np
from jax.experimental import pallas as pl
from jax.experimental.pallas import tpu as pltpu


# ----------------------------------------------------------------------------
# Glue: parameter-free sinusoidal timestep embedding (matches the PyTorch fn).
# ----------------------------------------------------------------------------
def transformer_timestep_embedding(timesteps, embedding_dim, max_positions=10000):
    assert timesteps.ndim == 1
    half_dim = embedding_dim // 2
    emb = math.log(max_positions) / (half_dim - 1)
    emb = jnp.exp(jnp.arange(half_dim, dtype=jnp.float32) * -emb)
    emb = timesteps.astype(jnp.float32)[:, None] * emb[None, :]
    emb = jnp.concatenate([jnp.sin(emb), jnp.cos(emb)], axis=1)
    if embedding_dim % 2 == 1:
        emb = jnp.pad(emb, ((0, 0), (0, 1)))
    return emb


# ----------------------------------------------------------------------------
# Pallas kernel: one (batch_tile, layer) grid step.
# ----------------------------------------------------------------------------
def _residual_mlp_kernel(
    num_layers, eps, d_model, hidden_chunk, fuse_film,
    # layer-invariant inputs
    h0_ref, temb_ref,
    # per-layer stacks (one layer visible per grid step, leading dim = 1)
    w1_ref, b1_ref, w2_ref, b2_ref, ln_g_ref, ln_b_ref,
    # *refs = [FiLM refs...] + [wout, bout] + [out] + [h scratch]
    *refs,
):
    if fuse_film:
        wtl_ref, btl_ref, wout_ref, bout_ref, out_ref, h_sc = refs
    else:
        (wtl_s_ref, btl_s_ref, wtl_h_ref, btl_h_ref,
         wout_ref, bout_ref, out_ref, h_sc) = refs

    f32 = jnp.float32
    n = pl.program_id(1)
    hidden_dim = w1_ref.shape[-1]

    def mm(a, b):
        # bf16 (or f32) MXU matmul with f32 accumulation.
        return jnp.dot(a.astype(b.dtype), b, preferred_element_type=f32)

    # Prologue: first layer step of each batch tile seeds the carried h.
    @pl.when(n == 0)
    def _():
        h_sc[...] = h0_ref[...].astype(f32)

    h = h_sc[...]
    temb = temb_ref[...].astype(f32)

    # Residual block n: Linear -> ReLU -> Linear.
    if hidden_chunk >= hidden_dim:
        h1 = jnp.maximum(mm(h, w1_ref[0]) + b1_ref[0], 0.0)
        h2 = mm(h1, w2_ref[0]) + b2_ref[0]
    else:
        # K-chunked over hidden_dim so the live intermediate is (tb, chunk),
        # not (tb, hidden) -> bounds vreg pressure / spill at large hidden.
        # (Static slice starts: zero-cost ref views, guaranteed lowering.)
        h2 = jnp.zeros(h.shape, f32)
        for k0 in range(0, hidden_dim, hidden_chunk):
            w1c = w1_ref[0, :, k0:k0 + hidden_chunk]
            b1c = b1_ref[0, :, k0:k0 + hidden_chunk]
            w2c = w2_ref[0, k0:k0 + hidden_chunk, :]
            h1c = jnp.maximum(mm(h, w1c) + b1c, 0.0)
            h2 = h2 + mm(h1c, w2c)
        h2 = h2 + b2_ref[0]

    hr = h + h2

    # LayerNorm over d_model (biased variance, eps = PyTorch default), in f32.
    mu = jnp.mean(hr, axis=-1, keepdims=True)
    var = jnp.mean((hr - mu) ** 2, axis=-1, keepdims=True)
    hn = (hr - mu) * jax.lax.rsqrt(var + eps)
    hn = hn * ln_g_ref[0] + ln_b_ref[0]

    # FiLM conditioning.
    if fuse_film:
        # d_model is 128-aligned: one full-width matmul fills the MXU, the
        # scale/shift split is a free lane-aligned slice of the f32 result.
        film = mm(temb, wtl_ref[0]) + btl_ref[0]
        scale = film[:, :d_model]
        shift = film[:, d_model:]
    else:
        scale = mm(temb, wtl_s_ref[0]) + btl_s_ref[0]
        shift = mm(temb, wtl_h_ref[0]) + btl_h_ref[0]
    h_sc[...] = scale * hn + shift

    # Epilogue: output projection into the lane-padded output block.
    @pl.when(n == num_layers - 1)
    def _():
        out_ref[...] = (mm(h_sc[...], wout_ref[...]) + bout_ref[...]
                        ).astype(out_ref.dtype)


# ----------------------------------------------------------------------------
# Generation-gated VMEM budget / core count, batch-tile picker.
# ----------------------------------------------------------------------------
def _tpu_vmem_budget_and_min_tiles():
    # Conservative default: budget against a 64 MiB/TC part with 2 TensorCores
    # (v7x-like).  v5e/v6e have 128 MiB VMEM and a single TensorCore per chip.
    budget = 48 * 1024 * 1024
    min_tiles = 2
    try:
        kind = jax.devices()[0].device_kind.lower()
    except Exception:
        kind = ""
    if ("v5" in kind) or ("v6" in kind):
        budget = 100 * 1024 * 1024
        min_tiles = 1
    return budget, min_tiles


def _vmem_per_tile_bytes(tb, *, d_model, hidden_dim, hidden_chunk, temb4,
                         out_pad, w_bytes):
    # Streamed per-layer weights (double-buffered by the pipeline).
    layer_w = (2 * d_model * hidden_dim + temb4 * 2 * d_model) * w_bytes
    layer_b = (hidden_dim + 5 * d_model) * 4
    streamed = 2 * (layer_w + layer_b)
    # Layer-invariant inputs (still allocated with 2 buffers by default).
    invariant = 2 * (tb * (d_model + temb4) * 4
                     + d_model * out_pad * w_bytes + out_pad * 4)
    # Output block (double-buffered) + carried-h scratch + live intermediates.
    out_blk = 2 * tb * out_pad * 4
    scratch = tb * d_model * 4
    live = tb * (hidden_chunk + 6 * d_model) * 4
    return streamed + invariant + out_blk + scratch + live


def _pick_batch_tile(B, *, min_tiles, fits):
    # 128-aligned tiles for MXU M-efficiency; whole batch for tiny B.
    cands = sorted((t for t in range(128, B + 1, 128) if B % t == 0),
                   reverse=True)
    if not cands:
        cands = [B]
    if min_tiles > 1 and B >= 256:
        multi = [t for t in cands if B // t >= min_tiles]
        if multi:
            cands = multi   # keep both TensorCores busy on 2-TC chips
    for t in cands:
        if fits(t):
            return t
    return cands[-1]


# ----------------------------------------------------------------------------
# Wrapper
# ----------------------------------------------------------------------------
def residual_mlp_forward(params, x, times, *, num_layers, d_model, temb_dim,
                         time_scale_factor, eps=1e-5,
                         weights_dtype=jnp.bfloat16, out_dtype=jnp.float32,
                         batch_tile=None, hidden_chunk=None):
    B, D = x.shape
    hidden_dim = params["w1"].shape[-1]
    out_dim = params["wout"].shape[1]
    temb4 = 4 * temb_dim
    f32 = jnp.float32

    # --- one-off glue in plain JAX (keeps wt1/wt2/win out of kernel VMEM) ---
    temb = transformer_timestep_embedding(times * time_scale_factor, temb_dim)
    t = jnp.maximum(temb @ params["wt1"] + params["bt1"], 0.0)
    temb = (t @ params["wt2"] + params["bt2"]).astype(f32)        # (B, 4*temb)
    h0 = (x @ params["win"] + params["bin"]).astype(f32)          # (B, d_model)

    # --- weight prep: pre-cast streamed weight stacks to bf16 in HBM --------
    wdt = weights_dtype
    w_bytes = jnp.dtype(wdt).itemsize
    w1 = params["w1"].astype(wdt)
    w2 = params["w2"].astype(wdt)
    b1 = params["b1"].astype(f32)
    b2 = params["b2"].astype(f32)
    ln_g = params["ln_g"].astype(f32)
    ln_b = params["ln_b"].astype(f32)

    fuse_film = (d_model % 128 == 0)
    if fuse_film:
        film_arrays = [params["wtl"].astype(wdt), params["btl"].astype(f32)]
    else:
        film_arrays = [params["wtl"][:, :, :d_model].astype(wdt),
                       params["btl"][:, :, :d_model].astype(f32),
                       params["wtl"][:, :, d_model:].astype(wdt),
                       params["btl"][:, :, d_model:].astype(f32)]

    # Lane-dense output: zero-pad output features up to a multiple of 128.
    out_pad = max(128, ((out_dim + 127) // 128) * 128)
    wout = jnp.pad(params["wout"], ((0, 0), (0, out_pad - out_dim))).astype(wdt)
    bout = jnp.pad(params["bout"], ((0, 0), (0, out_pad - out_dim))).astype(f32)

    # --- hidden-dim chunking (bounds the (tb, hidden) live intermediate) ----
    if hidden_chunk is None:
        hidden_chunk = hidden_dim
        if hidden_dim >= 1024:
            for c in (512, 384, 256, 128):
                if hidden_dim % c == 0:
                    hidden_chunk = c
                    break

    # --- batch tile against a generation-gated VMEM budget ------------------
    budget, min_tiles = _tpu_vmem_budget_and_min_tiles()

    def fits(tb_):
        return _vmem_per_tile_bytes(
            tb_, d_model=d_model, hidden_dim=hidden_dim,
            hidden_chunk=hidden_chunk, temb4=temb4, out_pad=out_pad,
            w_bytes=w_bytes) <= budget

    tb = batch_tile if batch_tile is not None else _pick_batch_tile(
        B, min_tiles=min_tiles, fits=fits)
    assert B % tb == 0, f"batch {B} must be divisible by batch tile {tb}"
    grid = (B // tb, num_layers)

    # --- BlockSpecs ----------------------------------------------------------
    def per_layer(shape):      # stacked per-layer param: (L, ...) -> (1, ...)
        return pl.BlockSpec((1,) + shape, lambda b, n: (n, 0, 0))

    def invariant(shape):      # full-array 2-D param, same block every step
        return pl.BlockSpec(shape, lambda b, n: (0, 0))

    in_specs = [
        pl.BlockSpec((tb, d_model), lambda b, n: (b, 0)),        # h0
        pl.BlockSpec((tb, temb4), lambda b, n: (b, 0)),          # processed temb
        per_layer((d_model, hidden_dim)), per_layer((1, hidden_dim)),   # w1, b1
        per_layer((hidden_dim, d_model)), per_layer((1, d_model)),      # w2, b2
        per_layer((1, d_model)), per_layer((1, d_model)),               # ln_g, ln_b
    ]
    if fuse_film:
        in_specs += [per_layer((temb4, 2 * d_model)), per_layer((1, 2 * d_model))]
    else:
        in_specs += [per_layer((temb4, d_model)), per_layer((1, d_model)),
                     per_layer((temb4, d_model)), per_layer((1, d_model))]
    in_specs += [invariant((d_model, out_pad)), invariant((1, out_pad))]

    out_specs = pl.BlockSpec((tb, out_pad), lambda b, n: (b, 0))

    # --- cost estimate (scheduler hint) --------------------------------------
    flops = int(B * num_layers * (4 * d_model * hidden_dim + 4 * temb4 * d_model)
                + 2 * B * d_model * out_pad)
    streamed_bytes = ((w1.size + w2.size + wout.size) * w_bytes
                      + sum(int(a.size) * a.dtype.itemsize for a in film_arrays))
    bytes_accessed = int((B // tb) * streamed_bytes
                         + (h0.size + temb.size + B * out_pad) * 4)
    cost = pl.CostEstimate(flops=flops, transcendentals=0,
                           bytes_accessed=bytes_accessed)

    kernel = functools.partial(_residual_mlp_kernel, num_layers, eps, d_model,
                               hidden_chunk, fuse_film)

    out_padded = pl.pallas_call(
        kernel,
        out_shape=jax.ShapeDtypeStruct((B, out_pad), out_dtype),
        grid_spec=pltpu.PrefetchScalarGridSpec(
            num_scalar_prefetch=0,
            grid=grid,
            in_specs=in_specs,
            out_specs=out_specs,
            scratch_shapes=[
                pltpu.VMEM((tb, d_model), jnp.float32),   # h carried over layers
            ]),
        compiler_params=pltpu.CompilerParams(
            dimension_semantics=("parallel", "arbitrary"),
            vmem_limit_bytes=budget),
        cost_estimate=cost,
    )(h0, temb, w1, b1, w2, b2, ln_g, ln_b, *film_arrays, wout, bout)

    return out_padded[:, :out_dim]


# ----------------------------------------------------------------------------
# Pure-JAX reference (mirrors the PyTorch module) for validation.
# ----------------------------------------------------------------------------
def residual_mlp_reference(params, x, times, *, num_layers, d_model, temb_dim,
                           time_scale_factor, eps=1e-5):
    temb = transformer_timestep_embedding(times * time_scale_factor, temb_dim)
    t = jnp.maximum(temb @ params["wt1"] + params["bt1"], 0.0)
    temb = t @ params["wt2"] + params["bt2"]

    h = x @ params["win"] + params["bin"]
    for n in range(num_layers):
        h1 = jnp.maximum(h @ params["w1"][n] + params["b1"][n], 0.0)
        h2 = h1 @ params["w2"][n] + params["b2"][n]
        hr = h + h2
        mu = jnp.mean(hr, axis=-1, keepdims=True)
        var = jnp.mean((hr - mu) ** 2, axis=-1, keepdims=True)
        hn = (hr - mu) / jnp.sqrt(var + eps)
        hn = hn * params["ln_g"][n] + params["ln_b"][n]
        film = temb @ params["wtl"][n] + params["btl"][n]
        h = film[:, 0:d_model] * hn + film[:, d_model:]
    return h @ params["wout"] + params["bout"]


# ----------------------------------------------------------------------------
# Deterministic parameter init (synthetic; matches the module's shapes).
# ----------------------------------------------------------------------------
def init_params(key, *, num_layers, d_model, hidden_dim, D, temb_dim, out_dim):
    ks = jax.random.split(key, 16)

    def w(k, shape, scale=0.1):
        return (scale * jax.random.normal(k, shape)).astype(jnp.float32)

    return {
        "wt1": w(ks[0], (temb_dim, hidden_dim)),
        "bt1": w(ks[1], (1, hidden_dim)),
        "wt2": w(ks[2], (hidden_dim, 4 * temb_dim)),
        "bt2": w(ks[3], (1, 4 * temb_dim)),
        "win": w(ks[4], (D, d_model)),
        "bin": w(ks[5], (1, d_model)),
        "w1": w(ks[6], (num_layers, d_model, hidden_dim)),
        "b1": w(ks[7], (num_layers, 1, hidden_dim)),
        "w2": w(ks[8], (num_layers, hidden_dim, d_model)),
        "b2": w(ks[9], (num_layers, 1, d_model)),
        "ln_g": jnp.ones((num_layers, 1, d_model), jnp.float32),
        "ln_b": jnp.zeros((num_layers, 1, d_model), jnp.float32),
        "wtl": w(ks[10], (num_layers, 4 * temb_dim, 2 * d_model)),
        "btl": w(ks[11], (num_layers, 1, 2 * d_model)),
        "wout": w(ks[12], (d_model, out_dim)),
        "bout": w(ks[13], (1, out_dim)),
    }


def _run_case(key, *, num_layers, d_model, hidden_dim, D, temb_dim, out_dim, B,
              weights_dtype, rtol, atol):
    kp, kx, kt = jax.random.split(key, 3)
    params = init_params(kp, num_layers=num_layers, d_model=d_model,
                         hidden_dim=hidden_dim, D=D, temb_dim=temb_dim,
                         out_dim=out_dim)
    x = jax.random.normal(kx, (B, D), dtype=jnp.float32)
    times = jax.random.uniform(kt, (B,), dtype=jnp.float32)
    time_scale_factor = 1000.0

    out = residual_mlp_forward(
        params, x, times, num_layers=num_layers, d_model=d_model,
        temb_dim=temb_dim, time_scale_factor=time_scale_factor,
        weights_dtype=weights_dtype)
    out = jax.block_until_ready(out)

    ref = residual_mlp_reference(
        params, x, times, num_layers=num_layers, d_model=d_model,
        temb_dim=temb_dim, time_scale_factor=time_scale_factor)
    ref = jax.block_until_ready(ref)

    np.testing.assert_allclose(np.asarray(out), np.asarray(ref),
                               rtol=rtol, atol=atol)
    assert out.shape == (B, out_dim)


if __name__ == "__main__":
    key = jax.random.PRNGKey(0)
    k1, k2 = jax.random.split(key, 2)

    # Case 1: small shapes, f32 weights (bit-matches the f32 reference);
    #         exercises the split-FiLM (d_model not 128-aligned) path.
    _run_case(k1, num_layers=2, d_model=32, hidden_dim=64, D=16,
              temb_dim=32, out_dim=16, B=8,
              weights_dtype=jnp.float32, rtol=1e-4, atol=1e-4)

    # Case 2: bf16 streamed weights (the perf configuration); exercises the
    #         fused-FiLM (d_model % 128 == 0) and hidden-chunked paths.
    _run_case(k2, num_layers=2, d_model=128, hidden_dim=1024, D=16,
              temb_dim=32, out_dim=16, B=8,
              weights_dtype=jnp.bfloat16, rtol=5e-2, atol=5e-2)

    print("KERNEL_OK")
</pallas_src>

<mosaic_0001>
module attributes {stable_mosaic.version = 11 : i64} {
  func.func @_residual_mlp_kernel(%arg0: i32, %arg1: i32, %arg2: memref<8x32xf32, #tpu.memory_space<vmem>>, %arg3: memref<8x128xf32, #tpu.memory_space<vmem>>, %arg4: memref<1x32x64xf32, #tpu.memory_space<vmem>>, %arg5: memref<1x1x64xf32, #tpu.memory_space<vmem>>, %arg6: memref<1x64x32xf32, #tpu.memory_space<vmem>>, %arg7: memref<1x1x32xf32, #tpu.memory_space<vmem>>, %arg8: memref<1x1x32xf32, #tpu.memory_space<vmem>>, %arg9: memref<1x1x32xf32, #tpu.memory_space<vmem>>, %arg10: memref<1x128x32xf32, #tpu.memory_space<vmem>>, %arg11: memref<1x1x32xf32, #tpu.memory_space<vmem>>, %arg12: memref<1x128x32xf32, #tpu.memory_space<vmem>>, %arg13: memref<1x1x32xf32, #tpu.memory_space<vmem>>, %arg14: memref<32x128xf32, #tpu.memory_space<vmem>>, %arg15: memref<1x128xf32, #tpu.memory_space<vmem>>, %arg16: memref<8x128xf32, #tpu.memory_space<vmem>>, %arg17: memref<8x32xf32, #tpu.memory_space<vmem>>) attributes {dimension_semantics = [#tpu.dimension_semantics<parallel>, #tpu.dimension_semantics<arbitrary>], iteration_bounds = array<i64: 1, 2>, scalar_prefetch = 0 : i64, scratch_operands = 1 : i64, tpu.core_type = #tpu.core_type<tc>, window_params = [{transform_indices = @transform_0, window_bounds = array<i64: 8, 32>}, {transform_indices = @transform_1, window_bounds = array<i64: 8, 128>}, {transform_indices = @transform_2, window_bounds = array<i64: 1, 32, 64>}, {transform_indices = @transform_3, window_bounds = array<i64: 1, 1, 64>}, {transform_indices = @transform_4, window_bounds = array<i64: 1, 64, 32>}, {transform_indices = @transform_5, window_bounds = array<i64: 1, 1, 32>}, {transform_indices = @transform_6, window_bounds = array<i64: 1, 1, 32>}, {transform_indices = @transform_7, window_bounds = array<i64: 1, 1, 32>}, {transform_indices = @transform_8, window_bounds = array<i64: 1, 128, 32>}, {transform_indices = @transform_9, window_bounds = array<i64: 1, 1, 32>}, {transform_indices = @transform_10, window_bounds = array<i64: 1, 128, 32>}, {transform_indices = @transform_11, window_bounds = array<i64: 1, 1, 32>}, {pipeline_mode = #tpu.pipeline_mode<synchronous>, transform_indices = @transform_12, window_bounds = array<i64: 32, 128>}, {pipeline_mode = #tpu.pipeline_mode<synchronous>, transform_indices = @transform_13, window_bounds = array<i64: 1, 128>}, {transform_indices = @transform_14, window_bounds = array<i64: 8, 128>}]} {
    %c0_i32 = arith.constant 0 : i32
    %0 = arith.cmpi eq, %arg1, %c0_i32 : i32
    %1 = arith.extui %0 : i1 to i32
    %c0_i32_0 = arith.constant 0 : i32
    %2 = arith.cmpi ne, %1, %c0_i32_0 : i32
    scf.if %2 {
      %c0_46 = arith.constant 0 : index
      %c0_47 = arith.constant 0 : index
      %68 = vector.load %arg2[%c0_46, %c0_47] : memref<8x32xf32, #tpu.memory_space<vmem>>, vector<8x32xf32>
      %c0_48 = arith.constant 0 : index
      %c0_49 = arith.constant 0 : index
      %69 = vector.load %arg17[%c0_48, %c0_49] : memref<8x32xf32, #tpu.memory_space<vmem>>, vector<8x32xf32>
      tpu.vector_store %arg17[%c0_48, %c0_49], %68 {strides = array<i32>} : memref<8x32xf32, #tpu.memory_space<vmem>>, vector<8x32xf32>,
    } else {
    }
    %c0 = arith.constant 0 : index
    %c0_1 = arith.constant 0 : index
    %3 = vector.load %arg17[%c0, %c0_1] : memref<8x32xf32, #tpu.memory_space<vmem>>, vector<8x32xf32>
    %c0_2 = arith.constant 0 : index
    %c0_3 = arith.constant 0 : index
    %4 = vector.load %arg3[%c0_2, %c0_3] : memref<8x128xf32, #tpu.memory_space<vmem>>, vector<8x128xf32>
    %c0_4 = arith.constant 0 : index
    %c0_5 = arith.constant 0 : index
    %c0_6 = arith.constant 0 : index
    %5 = vector.load %arg4[%c0_4, %c0_5, %c0_6] : memref<1x32x64xf32, #tpu.memory_space<vmem>>, vector<1x32x64xf32>
    %6 = vector.shape_cast %5 : vector<1x32x64xf32> to vector<32x64xf32>
    %cst = arith.constant dense<0.000000e+00> : vector<8x64xf32>
    %7 = tpu.matmul %3, %6, %cst {dimension_numbers = #tpu.dot_dimension_numbers<[1], [0], [0], [1], [0, 0, 1, 1], [], []>} : vector<8x32xf32>, vector<32x64xf32>, vector<8x64xf32> -> vector<8x64xf32>
    %c0_7 = arith.constant 0 : index
    %c0_8 = arith.constant 0 : index
    %c0_9 = arith.constant 0 : index
    %8 = vector.load %arg5[%c0_7, %c0_8, %c0_9] : memref<1x1x64xf32, #tpu.memory_space<vmem>>, vector<1x1x64xf32>
    %9 = vector.shape_cast %8 : vector<1x1x64xf32> to vector<1x64xf32>
    %10 = vector.broadcast %9 : vector<1x64xf32> to vector<8x64xf32>
    %11 = arith.addf %7, %10 : vector<8x64xf32>
    %cst_10 = arith.constant 0.000000e+00 : f32
    %12 = vector.broadcast %cst_10 : f32 to vector<8x64xf32>
    %13 = arith.maximumf %11, %12 : vector<8x64xf32>
    %c0_11 = arith.constant 0 : index
    %c0_12 = arith.constant 0 : index
    %c0_13 = arith.constant 0 : index
    %14 = vector.load %arg6[%c0_11, %c0_12, %c0_13] : memref<1x64x32xf32, #tpu.memory_space<vmem>>, vector<1x64x32xf32>
    %15 = vector.shape_cast %14 : vector<1x64x32xf32> to vector<64x32xf32>
    %cst_14 = arith.constant dense<0.000000e+00> : vector<8x32xf32>
    %16 = tpu.matmul %13, %15, %cst_14 {dimension_numbers = #tpu.dot_dimension_numbers<[1], [0], [0], [1], [0, 0, 1, 1], [], []>} : vector<8x64xf32>, vector<64x32xf32>, vector<8x32xf32> -> vector<8x32xf32>
    %c0_15 = arith.constant 0 : index
    %c0_16 = arith.constant 0 : index
    %c0_17 = arith.constant 0 : index
    %17 = vector.load %arg7[%c0_15, %c0_16, %c0_17] : memref<1x1x32xf32, #tpu.memory_space<vmem>>, vector<1x1x32xf32>
    %18 = vector.shape_cast %17 : vector<1x1x32xf32> to vector<1x32xf32>
    %19 = vector.broadcast %18 : vector<1x32xf32> to vector<8x32xf32>
    %20 = arith.addf %16, %19 : vector<8x32xf32>
    %21 = arith.addf %3, %20 : vector<8x32xf32>
    %cst_18 = arith.constant dense<0.000000e+00> : vector<8xf32>
    %22 = vector.multi_reduction <add>, %21, %cst_18 [1] : vector<8x32xf32> to vector<8xf32>
    %23 = vector.shape_cast %22 : vector<8xf32> to vector<8x1xf32>
    %cst_19 = arith.constant 3.200000e+01 : f32
    %24 = vector.broadcast %cst_19 : f32 to vector<8x1xf32>
    %25 = arith.divf %23, %24 : vector<8x1xf32>
    %26 = vector.broadcast %25 : vector<8x1xf32> to vector<8x32xf32>
    %27 = arith.subf %21, %26 : vector<8x32xf32>
    %28 = arith.mulf %27, %27 : vector<8x32xf32>
    %cst_20 = arith.constant dense<0.000000e+00> : vector<8xf32>
    %29 = vector.multi_reduction <add>, %28, %cst_20 [1] : vector<8x32xf32> to vector<8xf32>
    %30 = vector.shape_cast %29 : vector<8xf32> to vector<8x1xf32>
    %cst_21 = arith.constant 3.200000e+01 : f32
    %31 = vector.broadcast %cst_21 : f32 to vector<8x1xf32>
    %32 = arith.divf %30, %31 : vector<8x1xf32>
    %33 = vector.broadcast %25 : vector<8x1xf32> to vector<8x32xf32>
    %34 = arith.subf %21, %33 : vector<8x32xf32>
    %cst_22 = arith.constant 9.99999974E-6 : f32
    %35 = vector.broadcast %cst_22 : f32 to vector<8x1xf32>
    %36 = arith.addf %32, %35 : vector<8x1xf32>
    %37 = math.rsqrt %36 : vector<8x1xf32>
    %38 = vector.broadcast %37 : vector<8x1xf32> to vector<8x32xf32>
    %39 = arith.mulf %34, %38 : vector<8x32xf32>
    %c0_23 = arith.constant 0 : index
    %c0_24 = arith.constant 0 : index
    %c0_25 = arith.constant 0 : index
    %40 = vector.load %arg8[%c0_23, %c0_24, %c0_25] : memref<1x1x32xf32, #tpu.memory_space<vmem>>, vector<1x1x32xf32>
    %41 = vector.shape_cast %40 : vector<1x1x32xf32> to vector<1x32xf32>
    %42 = vector.broadcast %41 : vector<1x32xf32> to vector<8x32xf32>
    %43 = arith.mulf %39, %42 : vector<8x32xf32>
    %c0_26 = arith.constant 0 : index
    %c0_27 = arith.constant 0 : index
    %c0_28 = arith.constant 0 : index
    %44 = vector.load %arg9[%c0_26, %c0_27, %c0_28] : memref<1x1x32xf32, #tpu.memory_space<vmem>>, vector<1x1x32xf32>
    %45 = vector.shape_cast %44 : vector<1x1x32xf32> to vector<1x32xf32>
    %46 = vector.broadcast %45 : vector<1x32xf32> to vector<8x32xf32>
    %47 = arith.addf %43, %46 : vector<8x32xf32>
    %c0_29 = arith.constant 0 : index
    %c0_30 = arith.constant 0 : index
    %c0_31 = arith.constant 0 : index
    %48 = vector.load %arg10[%c0_29, %c0_30, %c0_31] : memref<1x128x32xf32, #tpu.memory_space<vmem>>, vector<1x128x32xf32>
    %49 = vector.shape_cast %48 : vector<1x128x32xf32> to vector<128x32xf32>
    %cst_32 = arith.constant dense<0.000000e+00> : vector<8x32xf32>
    %50 = tpu.matmul %4, %49, %cst_32 {dimension_numbers = #tpu.dot_dimension_numbers<[1], [0], [0], [1], [0, 0, 1, 1], [], []>} : vector<8x128xf32>, vector<128x32xf32>, vector<8x32xf32> -> vector<8x32xf32>
    %c0_33 = arith.constant 0 : index
    %c0_34 = arith.constant 0 : index
    %c0_35 = arith.constant 0 : index
    %51 = vector.load %arg11[%c0_33, %c0_34, %c0_35] : memref<1x1x32xf32, #tpu.memory_space<vmem>>, vector<1x1x32xf32>
    %52 = vector.shape_cast %51 : vector<1x1x32xf32> to vector<1x32xf32>
    %53 = vector.broadcast %52 : vector<1x32xf32> to vector<8x32xf32>
    %54 = arith.addf %50, %53 : vector<8x32xf32>
    %c0_36 = arith.constant 0 : index
    %c0_37 = arith.constant 0 : index
    %c0_38 = arith.constant 0 : index
    %55 = vector.load %arg12[%c0_36, %c0_37, %c0_38] : memref<1x128x32xf32, #tpu.memory_space<vmem>>, vector<1x128x32xf32>
    %56 = vector.shape_cast %55 : vector<1x128x32xf32> to vector<128x32xf32>
    %cst_39 = arith.constant dense<0.000000e+00> : vector<8x32xf32>
    %57 = tpu.matmul %4, %56, %cst_39 {dimension_numbers = #tpu.dot_dimension_numbers<[1], [0], [0], [1], [0, 0, 1, 1], [], []>} : vector<8x128xf32>, vector<128x32xf32>, vector<8x32xf32> -> vector<8x32xf32>
    %c0_40 = arith.constant 0 : index
    %c0_41 = arith.constant 0 : index
    %c0_42 = arith.constant 0 : index
    %58 = vector.load %arg13[%c0_40, %c0_41, %c0_42] : memref<1x1x32xf32, #tpu.memory_space<vmem>>, vector<1x1x32xf32>
    %59 = vector.shape_cast %58 : vector<1x1x32xf32> to vector<1x32xf32>
    %60 = vector.broadcast %59 : vector<1x32xf32> to vector<8x32xf32>
    %61 = arith.addf %57, %60 : vector<8x32xf32>
    %62 = arith.mulf %54, %47 : vector<8x32xf32>
    %63 = arith.addf %62, %61 : vector<8x32xf32>
    %c0_43 = arith.constant 0 : index
    %c0_44 = arith.constant 0 : index
    %64 = vector.load %arg17[%c0_43, %c0_44] : memref<8x32xf32, #tpu.memory_space<vmem>>, vector<8x32xf32>
    tpu.vector_store %arg17[%c0_43, %c0_44], %63 {strides = array<i32>} : memref<8x32xf32, #tpu.memory_space<vmem>>, vector<8x32xf32>,
    %c1_i32 = arith.constant 1 : i32
    %65 = arith.cmpi eq, %arg1, %c1_i32 : i32
    %66 = arith.extui %65 : i1 to i32
    %c0_i32_45 = arith.constant 0 : i32
    %67 = arith.cmpi ne, %66, %c0_i32_45 : i32
    scf.if %67 {
      %c0_46 = arith.constant 0 : index
      %c0_47 = arith.constant 0 : index
      %68 = vector.load %arg17[%c0_46, %c0_47] : memref<8x32xf32, #tpu.memory_space<vmem>>, vector<8x32xf32>
      %c0_48 = arith.constant 0 : index
      %c0_49 = arith.constant 0 : index
      %69 = vector.load %arg14[%c0_48, %c0_49] : memref<32x128xf32, #tpu.memory_space<vmem>>, vector<32x128xf32>
      %cst_50 = arith.constant dense<0.000000e+00> : vector<8x128xf32>
      %70 = tpu.matmul %68, %69, %cst_50 {dimension_numbers = #tpu.dot_dimension_numbers<[1], [0], [0], [1], [0, 0, 1, 1], [], []>} : vector<8x32xf32>, vector<32x128xf32>, vector<8x128xf32> -> vector<8x128xf32>
      %c0_51 = arith.constant 0 : index
      %c0_52 = arith.constant 0 : index
      %71 = vector.load %arg15[%c0_51, %c0_52] : memref<1x128xf32, #tpu.memory_space<vmem>>, vector<1x128xf32>
      %72 = vector.broadcast %71 : vector<1x128xf32> to vector<8x128xf32>
      %73 = arith.addf %70, %72 : vector<8x128xf32>
      %c0_53 = arith.constant 0 : index
      %c0_54 = arith.constant 0 : index
      %74 = vector.load %arg16[%c0_53, %c0_54] : memref<8x128xf32, #tpu.memory_space<vmem>>, vector<8x128xf32>
      tpu.vector_store %arg16[%c0_53, %c0_54], %73 {strides = array<i32>} : memref<8x128xf32, #tpu.memory_space<vmem>>, vector<8x128xf32>,
    } else {
    }
    return
  }
  func.func @transform_0(%arg0: i32, %arg1: i32) -> (i32, i32) {
    %c0_i32 = arith.constant 0 : i32
    %c0_i32_0 = arith.constant 0 : i32
    return %arg0, %c0_i32 : i32, i32
  }
  func.func @transform_1(%arg0: i32, %arg1: i32) -> (i32, i32) {
    %c0_i32 = arith.constant 0 : i32
    %c0_i32_0 = arith.constant 0 : i32
    return %arg0, %c0_i32 : i32, i32
  }
  func.func @transform_2(%arg0: i32, %arg1: i32) -> (i32, i32, i32) {
    %c0_i32 = arith.constant 0 : i32
    %c0_i32_0 = arith.constant 0 : i32
    %c0_i32_1 = arith.constant 0 : i32
    return %arg1, %c0_i32, %c0_i32_0 : i32, i32, i32
  }
  func.func @transform_3(%arg0: i32, %arg1: i32) -> (i32, i32, i32) {
    %c0_i32 = arith.constant 0 : i32
    %c0_i32_0 = arith.constant 0 : i32
    %c0_i32_1 = arith.constant 0 : i32
    return %arg1, %c0_i32, %c0_i32_0 : i32, i32, i32
  }
  func.func @transform_4(%arg0: i32, %arg1: i32) -> (i32, i32, i32) {
    %c0_i32 = arith.constant 0 : i32
    %c0_i32_0 = arith.constant 0 : i32
    %c0_i32_1 = arith.constant 0 : i32
    return %arg1, %c0_i32, %c0_i32_0 : i32, i32, i32
  }
  func.func @transform_5(%arg0: i32, %arg1: i32) -> (i32, i32, i32) {
    %c0_i32 = arith.constant 0 : i32
    %c0_i32_0 = arith.constant 0 : i32
    %c0_i32_1 = arith.constant 0 : i32
    return %arg1, %c0_i32, %c0_i32_0 : i32, i32, i32
  }
  func.func @transform_6(%arg0: i32, %arg1: i32) -> (i32, i32, i32) {
    %c0_i32 = arith.constant 0 : i32
    %c0_i32_0 = arith.constant 0 : i32
    %c0_i32_1 = arith.constant 0 : i32
    return %arg1, %c0_i32, %c0_i32_0 : i32, i32, i32
  }
  func.func @transform_7(%arg0: i32, %arg1: i32) -> (i32, i32, i32) {
    %c0_i32 = arith.constant 0 : i32
    %c0_i32_0 = arith.constant 0 : i32
    %c0_i32_1 = arith.constant 0 : i32
    return %arg1, %c0_i32, %c0_i32_0 : i32, i32, i32
  }
  func.func @transform_8(%arg0: i32, %arg1: i32) -> (i32, i32, i32) {
    %c0_i32 = arith.constant 0 : i32
    %c0_i32_0 = arith.constant 0 : i32
    %c0_i32_1 = arith.constant 0 : i32
    return %arg1, %c0_i32, %c0_i32_0 : i32, i32, i32
  }
  func.func @transform_9(%arg0: i32, %arg1: i32) -> (i32, i32, i32) {
    %c0_i32 = arith.constant 0 : i32
    %c0_i32_0 = arith.constant 0 : i32
    %c0_i32_1 = arith.constant 0 : i32
    return %arg1, %c0_i32, %c0_i32_0 : i32, i32, i32
  }
  func.func @transform_10(%arg0: i32, %arg1: i32) -> (i32, i32, i32) {
    %c0_i32 = arith.constant 0 : i32
    %c0_i32_0 = arith.constant 0 : i32
    %c0_i32_1 = arith.constant 0 : i32
    return %arg1, %c0_i32, %c0_i32_0 : i32, i32, i32
  }
  func.func @transform_11(%arg0: i32, %arg1: i32) -> (i32, i32, i32) {
    %c0_i32 = arith.constant 0 : i32
    %c0_i32_0 = arith.constant 0 : i32
    %c0_i32_1 = arith.constant 0 : i32
    return %arg1, %c0_i32, %c0_i32_0 : i32, i32, i32
  }
  func.func @transform_12(%arg0: i32, %arg1: i32) -> (i32, i32) {
    %c0_i32 = arith.constant 0 : i32
    %c0_i32_0 = arith.constant 0 : i32
    %c0_i32_1 = arith.constant 0 : i32
    return %c0_i32, %c0_i32_0 : i32, i32
  }
  func.func @transform_13(%arg0: i32, %arg1: i32) -> (i32, i32) {
    %c0_i32 = arith.constant 0 : i32
    %c0_i32_0 = arith.constant 0 : i32
    %c0_i32_1 = arith.constant 0 : i32
    return %c0_i32, %c0_i32_0 : i32, i32
  }
  func.func @transform_14(%arg0: i32, %arg1: i32) -> (i32, i32) {
    %c0_i32 = arith.constant 0 : i32
    %c0_i32_0 = arith.constant 0 : i32
    return %arg0, %c0_i32 : i32, i32
  }
}

</mosaic_0001>

<bundles_post_ra>
// kernel: tpu_custom_call.1
= control target key start
LH: loop header
LB: loop body
LE: loop exit
PB: predicated region body
PF: predicated region fallthrough
CT: control target
= control target key end

     0   :  { %s1453_s0 = inlined_call_operand.vmem [shape: f32[8,32], index: 0, kind: input, shape index: {}]   ;;  %s1454_s1 = inlined_call_operand.vmem [shape: f32[8,128], index: 1, kind: input, shape index: {}]   ;;  %s1455_s2 = inlined_call_operand.vmem [shape: f32[2,32,64], index: 2, kind: input, shape index: {}]   ;;  %s1456_s3 = inlined_call_operand.vmem [shape: f32[2,1,64], index: 3, kind: input, shape index: {}]   ;;  %s1457_s4 = inlined_call_operand.vmem [shape: f32[2,64,32], index: 4, kind: input, shape index: {}]   ;;  %s1458_s5 = inlined_call_operand.vmem [shape: f32[2,1,32], index: 5, kind: input, shape index: {}]   ;;  %s1459_s6 = inlined_call_operand.vmem [shape: f32[2,1,32], index: 6, kind: input, shape index: {}]   ;;  %s1460_s7 = inlined_call_operand.vmem [shape: f32[2,1,32], index: 7, kind: input, shape index: {}]   ;;  %s1461_s8 = inlined_call_operand.vmem [shape: f32[2,128,32], index: 8, kind: input, shape index: {}]   ;;  %s1462_s9 = inlined_call_operand.vmem [shape: f32[2,1,32], index: 9, kind: input, shape index: {}]   ;;  %s1463_s10 = inlined_call_operand.vmem [shape: f32[2,128,32], index: 10, kind: input, shape index: {}]   ;;  %s1464_s11 = inlined_call_operand.vmem [shape: f32[2,1,32], index: 11, kind: input, shape index: {}]   ;;  %s1465_s12 = inlined_call_operand.vmem [shape: f32[32,128], index: 12, kind: input, shape index: {}]   ;;  %s1466_s13 = inlined_call_operand.vmem [shape: f32[1,128], index: 13, kind: input, shape index: {}]   ;;  %s1467_s14 = inlined_call_operand.hbm [shape: f32[8,128], index: 14, kind: output, shape index: {}]  }
   0x1   :  { %1471 = sst [smem:[#allocation9_spill]] %s1455_s2 }
   0x2   :  { %1472 = sst [smem:[#allocation10_spill]] %s1465_s12 }
   0x3   :  { %1473 = sst [smem:[#allocation11_spill]] %s1466_s13 }
   0x4   :  { %1474 = sst [smem:[#allocation12_spill]] %s1467_s14 }
   0x5   :  { %19 = vsyncpa [#allocation4], 0  ;;  %s1271_s29 = smov 0   ;;  %s1273_s30 = smov 0  }
   0x6   :  { %s1275_s15 = smov 0  }
   0x7 LB: > { %1475 = sst [smem:[#allocation6_spill]] %s1188_s30  ;;  %s34_s17 = sadd.s32 1, %s1188_s30  ;;  %s1192_s15 = sphi %s1275_s15, %s25_s15   ;;  %s1188_s30 = sphi %s1273_s30, %s1488_s30   ;;  %s1184_s29 = sphi %s1271_s29, %s1487_s29  }
   0x8   : > { %1476 = sst [smem:[#allocation7_spill]] %s1192_s15  ;;  %p35_p0 = scmp.ge.s32.totalorder %s34_s17, 2 }
   0x9   : > { %p1073_p1 = scmp.ge.s32.totalorder %s1192_s15, 1  ;;  %p521_p2 = scmp.lt.s32.totalorder %s1192_s15, 3 }
   0xa   : > { %s1490_s17 = smov (%p35_p0, %s34_s17), 0 }
   0xb   : > { %1477 = sst [smem:[#allocation8_spill]] %s1490_s17  ;;  %p522_p3 = pnand %p1073_p1, %p521_p2 }
   0xc   : > { %p611_p4 = scmp.lt.s32.totalorder (!%p522_p3), %s1184_s29, 1  ;;  %s1478_s2 = sld [smem:[#allocation9_spill]] (!%p522_p3) }
   0xd   : > { %525 = sbr.rel (%p522_p3) target bundleno = 722 (0x2d2), region = 76  ;;  %p1082_p5 = scmp.ne.s32.totalorder (!%p522_p3), %s1184_s29, 0 }
  0x12   : > { %s1294_s18 = scalar_select %p611_p4, %s1184_s29, 1 }
  0x14   : > { %s1091_s19 = sshll.u32 %s1294_s18, 5  ;;  %s1092_s26 = sshll.u32 %s1294_s18, 6 }
  0x15   : > { %s615_s25 = scalar_lea.vmem %s1478_s2, %s1091_s19  ;;  %s1308_s16 = scalar_lea.vmem %s1457_s4, %s1092_s26 }
  0x16   : > { %s629_s12 = scalar_lea.vmem %s1459_s6, %s1294_s18  ;;  %s632_s22 = scalar_lea.vmem %s1460_s7, %s1294_s18 }
  0x17   : > { %s1093_s23 = sshll.u32 %s1294_s18, 7  ;;  %s640_s2 = scalar_lea.vmem %s1462_s9, %s1294_s18 }
  0x18   : > { %s1330_s28 = scalar_lea.vmem %s1461_s8, %s1093_s23  ;;  %s1335_s14 = scalar_lea.vmem %s1463_s10, %s1093_s23 }
  0x19   : > { %s648_s20 = scalar_lea.vmem %s1464_s11, %s1294_s18  ;;  %652 = sbr.rel (%p1082_p5) target bundleno = 32 (0x20), region = 80 }
  0x1e   : > { %v653_v0 = vld [vmem:[%s1453_s0] sm:$0xff]  ;;  %vm654_vm0 = vcmask 261120  }
  0x1f   : > { %655 = vst.msk [vmem:[#allocation2] sm:$0xff] %vm654_vm0, %v653_v0 }
  0x20 PF: > { %v661_v1 = vld [vmem:[%s615_s25 + $0x18] sm:$0xff]  ;;  %v660_v2 = vld [vmem:[%s615_s25 + $0x10] sm:$0xff]  ;;  %v659_v4 = vld [vmem:[%s615_s25 + $0x8] sm:$0xff]  ;;  %vm666_vm1 = vcmask 261120   ;;  %s1479_s24 = scalar_lea.vmem %s1456_s3, %s1294_s18  ;;  %vm703_vm2 = vcmask 523264   ;;  %s1480_s26 = scalar_lea.vmem %s1458_s5, %s1294_s18  ;;  %v1194_v44 = vmov 32.0  }
  0x21   : > { %682 = vmatpush.msra.mxu0 %v661_v1  ;;  %v698_v3 = vld [vmem:[%s1308_s16 + $0x38] sm:$0xff]  ;;  %v658_v5 = vld [vmem:[%s615_s25] sm:$0xff]  ;;  %v697_v6 = vld [vmem:[%s1308_s16 + $0x30] sm:$0xff]  ;;  %1133 = vrcp.f32 %v1194_v44  ;;  %p1085_p6 = scmp.ne.s32.totalorder %s1184_s29, 1 }
  0x22   : > { %715 = vmatpush.msra.mxu1 %v698_v3  ;;  %v696_v8 = vld [vmem:[%s1308_s16 + $0x28] sm:$0xff]  ;;  %v695_v9 = vld [vmem:[%s1308_s16 + $0x20] sm:$0xff]  ;;  %v694_v10 = vld [vmem:[%s1308_s16 + $0x18] sm:$0xff]  ;;  %s1482_s17 = sld [smem:[#allocation11_spill]] (!%p1085_p6) }
  0x23   : > { %683 = vmatpush.msra.mxu0 %v660_v2  ;;  %v693_v11 = vld [vmem:[%s1308_s16 + $0x10] sm:$0xff]  ;;  %v692_v12 = vld [vmem:[%s1308_s16 + $0x8] sm:$0xff]  ;;  %v691_v13 = vld [vmem:[%s1308_s16] sm:$0xff] }
  0x24   : > { %716 = vmatpush.msra.mxu1 %v697_v6  ;;  %v1127_v14 = vld [vmem:[%s1479_s24] ss:$0 sm:$0xff]  ;;  %v782_v18 = vld [vmem:[%s1330_s28 + $0x78] sm:$0xff]  ;;  %v781_v19 = vld [vmem:[%s1330_s28 + $0x70] sm:$0xff] }
  0x25   : > { %684 = vmatpush.msra.mxu0 %v659_v4  ;;  %v822_v20 = vld [vmem:[%s1335_s14 + $0x78] sm:$0xff]  ;;  %787 = vmatpush.msra.mxu2 %v782_v18  ;;  %v821_v21 = vld [vmem:[%s1335_s14 + $0x70] sm:$0xff]  ;;  %v780_v22 = vld [vmem:[%s1330_s28 + $0x68] sm:$0xff] }
  0x26   : > { %v656_v7 = vld [vmem:[#allocation2] sm:$0xff]  ;;  %717 = vmatpush.msra.mxu1 %v696_v8  ;;  %827 = vmatpush.msra.mxu3 %v822_v20  ;;  %v820_v23 = vld [vmem:[%s1335_s14 + $0x68] sm:$0xff]  ;;  %v778_v26 = vld [vmem:[%s1330_s28 + $0x58] sm:$0xff] }
  0x27   : > { %685 = vmatpush.msra.mxu0 %v658_v5  ;;  %788 = vmatpush.msra.mxu2 %v781_v19  ;;  %v779_v24 = vld [vmem:[%s1330_s28 + $0x60] sm:$0xff]  ;;  %v818_v27 = vld [vmem:[%s1335_s14 + $0x58] sm:$0xff]  ;;  %v777_v28 = vld [vmem:[%s1330_s28 + $0x50] sm:$0xff]  ;;  %v1134_v51 = vpop.eup %1133 }
  0x28   : > { %1083 = vmatmul.msk.f32.vlgmr.msra.gmra.mxu0 %vm666_vm1, %v656_v7  ;;  %718 = vmatpush.msra.mxu1 %v695_v9  ;;  %v819_v25 = vld [vmem:[%s1335_s14 + $0x60] sm:$0xff]  ;;  %v817_v29 = vld [vmem:[%s1335_s14 + $0x50] sm:$0xff]  ;;  %v776_v30 = vld [vmem:[%s1330_s28 + $0x48] sm:$0xff]  ;;  %v732_v54 = vmul.f32 32.0, %v1134_v51  ;;  %vm736_vm3 = vweird.f32 %v1134_v51 }
  0x29   : > { %828 = vmatpush.msra.mxu3 %v821_v21  ;;  %789 = vmatpush.msra.mxu2 %v780_v22  ;;  %v1128_v31 = vld [vmem:[%s1480_s26] ss:$0 sm:$0xff]  ;;  %v816_v37 = vld [vmem:[%s1335_s14 + $0x48] sm:$0xff]  ;;  %v774_v38 = vld [vmem:[%s1330_s28 + $0x38] sm:$0xff] }
  0x2a   : > { %719 = vmatpush.msra.mxu1 %v694_v10  ;;  %v775_v36 = vld [vmem:[%s1330_s28 + $0x40] sm:$0xff]  ;;  %v773_v40 = vld [vmem:[%s1330_s28 + $0x30] sm:$0xff]  ;;  %v814_v41 = vld [vmem:[%s1335_s14 + $0x38] sm:$0xff]  ;;  %v733_v59 = vsub.f32 1.0, %v732_v54 }
  0x2b   : > { %829 = vmatpush.msra.mxu3 %v820_v23  ;;  %790 = vmatpush.msra.mxu2 %v779_v24  ;;  %v815_v39 = vld [vmem:[%s1335_s14 + $0x40] sm:$0xff]  ;;  %v772_v42 = vld [vmem:[%s1330_s28 + $0x28] sm:$0xff]  ;;  %v813_v43 = vld [vmem:[%s1335_s14 + $0x30] sm:$0xff] }
  0x2c   : > { %720 = vmatpush.msra.mxu1 %v693_v11  ;;  %v771_v45 = vld [vmem:[%s1330_s28 + $0x20] sm:$0xff]  ;;  %v812_v46 = vld [vmem:[%s1335_s14 + $0x28] sm:$0xff]  ;;  %v770_v47 = vld [vmem:[%s1330_s28 + $0x18] sm:$0xff]  ;;  %v734_v60 = vmul.f32 %v1134_v51, %v733_v59 }
  0x2d   : > { %830 = vmatpush.msra.mxu3 %v819_v25  ;;  %791 = vmatpush.msra.mxu2 %v778_v26  ;;  %v811_v48 = vld [vmem:[%s1335_s14 + $0x20] sm:$0xff]  ;;  %v769_v49 = vld [vmem:[%s1330_s28 + $0x10] sm:$0xff]  ;;  %v810_v50 = vld [vmem:[%s1335_s14 + $0x18] sm:$0xff] }
  0x2e   : > { %721 = vmatpush.msra.mxu1 %v692_v12  ;;  %v768_v52 = vld [vmem:[%s1330_s28 + $0x8] sm:$0xff]  ;;  %v809_v53 = vld [vmem:[%s1335_s14 + $0x10] sm:$0xff]  ;;  %v767_v55 = vld [vmem:[%s1330_s28] sm:$0xff]  ;;  %v735_v61 = vadd.f32 %v1134_v51, %v734_v60 }
  0x2f   : > { %831 = vmatpush.msra.mxu3 %v818_v27  ;;  %792 = vmatpush.msra.mxu2 %v777_v28  ;;  %v808_v56 = vld [vmem:[%s1335_s14 + $0x8] sm:$0xff]  ;;  %v657_v57 = vld [vmem:[%s1454_s1] sm:$0xff] }
  0x30   : > { %722 = vmatpush.msra.mxu1 %v691_v13  ;;  %v807_v58 = vld [vmem:[%s1335_s14] sm:$0xff]  ;;  %v737_v62 = vsel %vm736_vm3, %v1134_v51, %v735_v61 }
  0x31   : > { %832 = vmatpush.msra.mxu3 %v817_v29  ;;  %793 = vmatpush.msra.mxu2 %v776_v30  ;;  %v1129_v13 = vld [vmem:[%s629_s12] ss:$0 sm:$0xff] }
  0x32   : > { %v1130_v18 = vld [vmem:[%s632_s22] ss:$0 sm:$0xff]  ;;  %s1481_s22 = sld [smem:[#allocation10_spill]] (!%p1085_p6) }
  0x33   : > { %794 = vmatpush.msra.mxu2 %v775_v36  ;;  %833 = vmatpush.msra.mxu3 %v816_v37  ;;  %v1132_v19 = vld [vmem:[%s648_s20] ss:$0 sm:$0xff] }
  0x35   : > { %795 = vmatpush.msra.mxu2 %v774_v38  ;;  %834 = vmatpush.msra.mxu3 %v815_v39 }
  0x37   : > { %796 = vmatpush.msra.mxu2 %v773_v40  ;;  %835 = vmatpush.msra.mxu3 %v814_v41 }
  0x39   : > { %797 = vmatpush.msra.mxu2 %v772_v42  ;;  %836 = vmatpush.msra.mxu3 %v813_v43 }
  0x3b   : > { %798 = vmatpush.msra.mxu2 %v771_v45  ;;  %837 = vmatpush.msra.mxu3 %v812_v46 }
  0x3d   : > { %799 = vmatpush.msra.mxu2 %v770_v47  ;;  %838 = vmatpush.msra.mxu3 %v811_v48 }
  0x3f   : > { %800 = vmatpush.msra.mxu2 %v769_v49  ;;  %839 = vmatpush.msra.mxu3 %v810_v50 }
  0x41   : > { %801 = vmatpush.msra.mxu2 %v768_v52  ;;  %840 = vmatpush.msra.mxu3 %v809_v53 }
  0x43   : > { %802 = vmatpush.msra.mxu2 %v767_v55  ;;  %841 = vmatpush.msra.mxu3 %v808_v56 }
  0x44   : > { %803 = vmatmul.f32.vlgmr.msra.gmra.mxu2 %v657_v57 }
  0x45   : > { %842 = vmatpush.msra.mxu3 %v807_v58 }
  0x46   : > { %843 = vmatmul.f32.vlgmr.msra.gmra.mxu3 %v657_v57 }
  0xa5   : > { %v687_v15 = vpop.f32.mrf.mxu0 }
  0xa6   : > { %v688_v16 = vadd.f32 %v1127_v14, %v687_v15  ;;  %v1131_v14 = vld [vmem:[%s640_s2] ss:$0 sm:$0xff] }
  0xa8   : > { %v690_v17 = vmax.f32 %v688_v16, 0.0 }
  0xaa   : > { %1084 = vmatmul.msk.f32.vlgmr.msra.gmra.mxu1 %vm703_vm2, %v690_v17 }
  0xc7   : > { %v804_v16 = vpop.f32.mrf.mxu2 }
  0xc8   : > { %v805_v22 = vadd.f32 %v1131_v14, %v804_v16 }
  0xc9   : > { %v844_v20 = vpop.f32.mrf.mxu3 }
  0xca   : > { %v845_v24 = vadd.f32 %v1132_v19, %v844_v20 }
 0x127   : > { %v724_v32 = vpop.f32.mrf.mxu1 }
 0x128   : > { %v725_v33 = vadd.f32 %v1128_v31, %v724_v32 }
 0x12a   : > { %v727_v34 = vadd.f32 %v725_v33, %v656_v7 }
 0x12c   : > { %v728_v35 = vsel %vm666_vm1, %v727_v34, 0.0 }
 0x12d   : > { %729 = vadd.xlane.f32.xlu0 %v728_v35 }
 0x1a0   : > { %v730_v63 = vpop.xlane.xlu0 %729 }
 0x1a1   : > { %v738_v0 = vmul.f32 %v737_v62, %v730_v63 }
 0x1a3   : > { %v739_v1 = vsub.f32 %v727_v34, %v738_v0 }
 0x1a5   : > { %v740_v2 = vmul.f32 %v739_v1, %v739_v1 }
 0x1a7   : > { %v741_v3 = vsel %vm666_vm1, %v740_v2, 0.0 }
 0x1a8   : > { %742 = vadd.xlane.f32.xlu0 %v741_v3 }
 0x21b   : > { %v743_v4 = vpop.xlane.xlu0 %742 }
 0x21c   : > { %v744_v5 = vmul.f32 %v743_v4, %v737_v62 }
 0x21e   : > { %v745_v6 = vadd.f32 1e-05, %v744_v5 }
 0x220   : > { %1135 = vrsqrt.f32 %v745_v6  ;;  %vm752_vm5 = vweird.f32 %v745_v6 }
 0x226   : > { %v1136_v7 = vpop.eup %1135 }
 0x227   : > { %v747_v8 = vmul.f32 %v1136_v7, %v745_v6  ;;  %vm753_vm4 = vweird.f32 %v1136_v7 }
 0x228   : > { %vm754_vm6 = vmor %vm752_vm5, %vm753_vm4 }
 0x229   : > { %v748_v9 = vmul.f32 %v1136_v7, %v747_v8 }
 0x22b   : > { %v749_v10 = vmul.f32 0.5, %v748_v9 }
 0x22d   : > { %v750_v11 = vsub.f32 1.5, %v749_v10 }
 0x22f   : > { %v751_v12 = vmul.f32 %v1136_v7, %v750_v11 }
 0x231   : > { %v755_v15 = vsel %vm754_vm6, %v1136_v7, %v751_v12 }
 0x232   : > { %v756_v17 = vmul.f32 %v755_v15, %v739_v1 }
 0x234   : > { %v761_v21 = vmul.f32 %v1129_v13, %v756_v17 }
 0x236   : > { %v766_v23 = vadd.f32 %v1130_v18, %v761_v21 }
 0x238   : > { %v847_v25 = vmul.f32 %v805_v22, %v766_v23  ;;  %853 = sbr.rel (%p1085_p6) target bundleno = 710 (0x2c6), region = 84 }
 0x23a   : > { %v848_v26 = vadd.f32 %v847_v25, %v845_v24 }
 0x23c   : > { %849 = vst.msk [vmem:[#allocation2] sm:$0xff] %vm666_vm1, %v848_v26 }
 0x23d   : > { %v858_v27 = vld [vmem:[%s1481_s22 + $0x18] sm:$0xff]  ;;  %v857_v28 = vld [vmem:[%s1481_s22 + $0x10] sm:$0xff]  ;;  %v856_v29 = vld [vmem:[%s1481_s22 + $0x8] sm:$0xff] }
 0x23e   : > { %878 = vmatpush.msra.mxu0 %v858_v27  ;;  %v855_v30 = vld [vmem:[%s1481_s22] sm:$0xff] }
 0x23f   : > { %v1137_v32 = vld [vmem:[%s1482_s17] ss:$0 sm:$0xff] }
 0x240   : > { %879 = vmatpush.msra.mxu0 %v857_v28 }
 0x242   : > { %880 = vmatpush.msra.mxu0 %v856_v29 }
 0x243   : > { %v854_v31 = vld [vmem:[#allocation2] sm:$0xff] }
 0x244   : > { %881 = vmatpush.msra.mxu0 %v855_v30 }
 0x245   : > { %1086 = vmatmul.msk.f32.vlgmr.msra.gmra.mxu0 %vm666_vm1, %v854_v31 }
 0x2c2   : > { %v883_v33 = vpop.f32.mrf.mxu0 }
 0x2c3   : > { %v884_v34 = vadd.f32 %v1137_v32, %v883_v33 }
 0x2c5   : > { %886 = vst [vmem:[#allocation3] sm:$0xff] %v884_v34 }
 0x2c6 PF: > { %s1483_s14 = sld [smem:[#allocation7_spill]]  ;;  %s1195_s25 = smov [#allocation3]  }
 0x2c7   : > { %s1485_s21 = sld [smem:[#allocation12_spill]]  ;;  %s895_s23 = sshll.u32 %s1195_s25, 4  ;;  %s896_s23 = int_to_ptr.vmem [resolvable:$true] %s895_s23 }
 0x2cc   : > { %s1484_s28 = sadd.s32 4294967295, %s1483_s14  }
 0x2cd   : > { %p1099_p7 = scmp.eq.s32.totalorder %s1484_s28, 1  ;;  %s897_s19 = sshll.u32 %s1485_s21, 4  ;;  %s898_s19 = int_to_ptr.hbm [resolvable:$true] %s897_s19 }
 0x2cf   : > { %1096 = dma.vmem_to_hbm [thread:$0]  (%p1099_p7), %s896_s23, 128, %s898_s19, [#allocation4]  }
 0x2d0   : > { %1179 = dma.done.wait (%p1099_p7), [#allocation4], 128  }
 0x2d1   : > { %1181 = vsyncadd (%p1099_p7), [#allocation4], 4294967168 }
 0x2d2 PF: > { %s1486_s2 = sld [smem:[#allocation7_spill]] }
 0x2d3   : > { %s1487_s29 = sld [smem:[#allocation6_spill]] }
 0x2d4   : > { %s1488_s30 = sld [smem:[#allocation8_spill]] }
 0x2d8   : > { %s25_s15 = sadd.s32 1, %s1486_s2  }
 0x2d9   : > { %p22_p8 = scmp.ge.s32.totalorder %s25_s15, 4  }
 0x2db   :  { %24 = sbr.rel (!%p22_p8) target bundleno = 7 (0x7), region = 145 }
 0x2e0   :  { %911 = vsyncpa [#allocation4], 1 }
 0x2e1   :  { %913 = vsyncpa [#allocation4 + $0x1], 1 }

</bundles_post_ra>
